<compile_context>
chip_gen: v7x
topology: tpu7x:2x2x1
jax: 0.10.0
libtpu: 0.0.40
codegen_flags: <defaults>
</compile_context>

<pallas_src>
import functools

import jax
import jax.numpy as jnp
from jax.experimental import pallas as pl
from jax.experimental.pallas import tpu as pltpu


def _round_up(a, m):
    return ((a + m - 1) // m) * m


def _binarize_f32(v):
    # +1 if v >= 0 else -1  (matches BinarizeF forward), computed in f32
    return jnp.where(v >= 0.0, 1.0, -1.0)


def net_kernel(x_ref, w0b_ref, w1b_ref, o_ref):
    """Fused binarize + two binary-matmul+ReLU layers for one batch tile.

    x_ref   : (TB, IN)    f32 raw pixels (binarized in-kernel on the VPU)
    w0b_ref : (IN, H0)    bf16 pre-binarized fc0 weight, transposed
    w1b_ref : (H0, NPAD)  bf16 pre-binarized fc1 weight, transposed and
                          zero-padded on the output dim to 128 lanes
    o_ref   : (TB, NPAD)  int16 (exact: outputs are integers <= H0*IN)
    """
    # binarize(x - 0.5): +1 if x >= 0.5 else -1 (compare/select is free VALU work)
    xb = jnp.where(x_ref[...] >= 0.5, 1.0, -1.0).astype(jnp.bfloat16)

    # layer 0: binary matmul + relu (f32 accumulation on the MXU); h is an
    # integer in [0, IN] -> exact in bf16 for this config (IN <= 256).
    h = jnp.dot(xb, w0b_ref[...], preferred_element_type=jnp.float32)
    h = jnp.maximum(h, 0.0)

    # layer 1: output integers <= H0*IN (= 8192 here)
    y = jnp.dot(h.astype(jnp.bfloat16), w1b_ref[...],
                preferred_element_type=jnp.float32)
    y = jnp.maximum(y, 0.0)

    # exact integer narrowing -> 2x smaller HBM writeback
    o_ref[...] = y.astype(jnp.int32).astype(jnp.int16)


@functools.partial(jax.jit, static_argnames=("layers", "tb_max"))
def net_forward(x_nchw, w0, w1, layers, tb_max=512):
    """x_nchw: (B, 1, H, W) float32. w0: (H0, IN), w1: (H1, H0) PyTorch layout."""
    in_size = x_nchw.shape[-1] * x_nchw.shape[-2]
    # exactness guards for the narrowed dtypes used in the kernel
    assert in_size <= 256, "bf16 intermediate is exact only for in_size <= 256"
    assert layers[0] * in_size <= 32767, "int16 output requires H0*in_size <= 32767"

    x2d = x_nchw.reshape(-1, in_size).astype(jnp.float32)   # == x.view(-1, in_size)
    Bv = x2d.shape[0]

    # --- weights: binarize once outside the kernel (tiny), (out,in) -> (in,out) ---
    w0b = _binarize_f32(w0).astype(jnp.bfloat16).T           # (IN, H0) +/-1
    w1b = _binarize_f32(w1).astype(jnp.bfloat16).T           # (H0, H1) +/-1
    H0, H1 = w1b.shape

    # lane-dense output: pad fc1 output dim to a multiple of 128 with zeros
    npad = _round_up(max(H1, 128), 128)
    w1bp = jnp.pad(w1b, ((0, 0), (0, npad - H1)))

    # --- batch tiling ---------------------------------------------------------
    # tb ~512 rows: grid gets multiple steps (double-buffering; v7x TC split)
    # while each step stays well under the VMEM limit.  Ragged batches are
    # handled by Pallas' masked edge blocks — no full-batch materialized pad.
    tb_target = _round_up(tb_max, 16)
    if Bv <= tb_target:
        bp = _round_up(Bv, 8)                                 # pad <= 7 rows, tiny batch only
        if bp > Bv:
            x2d = jnp.pad(x2d, ((0, bp - Bv), (0, 0)))
        tb = bp
        grid_b = 1
    else:
        tb = tb_target
        grid_b = pl.cdiv(Bv, tb)                              # last input block masked
    out_rows = tb * grid_b                                    # block-aligned output

    cost = pl.CostEstimate(
        flops=2 * Bv * (in_size * H0 + H0 * npad),
        transcendentals=0,
        bytes_accessed=(Bv * in_size * 4            # f32 activations in
                        + in_size * H0 * 2 + H0 * npad * 2   # bf16 weights
                        + Bv * npad * 2),           # int16 out
    )

    y = pl.pallas_call(
        net_kernel,
        out_shape=jax.ShapeDtypeStruct((out_rows, npad), jnp.int16),
        grid=(grid_b,),
        in_specs=[
            pl.BlockSpec((tb, in_size), lambda i: (i, 0)),    # streamed batch tile
            pl.BlockSpec((in_size, H0), lambda i: (0, 0)),    # weights stay resident
            pl.BlockSpec((H0, npad), lambda i: (0, 0)),
        ],
        out_specs=pl.BlockSpec((tb, npad), lambda i: (i, 0)),
        compiler_params=pltpu.CompilerParams(
            dimension_semantics=("parallel",),                # v7x: shard across 2 TCs
            vmem_limit_bytes=32 * 1024 * 1024,
        ),
        cost_estimate=cost,
    )(x2d, w0b, w1bp)

    y = y[:Bv, :H1].astype(jnp.float32)
    if layers[-1] == 1:
        y = jnp.concatenate([y, 1.0 - y], axis=-1)
    return y


def net_reference(x_nchw, w0, w1, layers):
    """Plain-JAX reference mirroring the PyTorch forward (classic=1, with_norm=0, binary=True)."""
    in_size = x_nchw.shape[-1] * x_nchw.shape[-2]
    x = x_nchw.reshape(-1, in_size).astype(jnp.float32)
    x = _binarize_f32(x - 0.5)
    x = x @ _binarize_f32(w0).T
    x = jnp.maximum(x, 0.0)
    x = x @ _binarize_f32(w1).T
    x = jnp.maximum(x, 0.0)
    if layers[-1] == 1:
        x = jnp.concatenate([x, 1.0 - x], axis=-1)
    return x


if __name__ == "__main__":
    # small, deterministic config
    img_size = 16
    layers = (32, 4)
    in_size = img_size * img_size

    key = jax.random.PRNGKey(0)
    kx, k0, k1, kx2, kx3 = jax.random.split(key, 5)

    # deterministic real-valued weights (binarized on the fly),
    # PyTorch nn.Linear layout: (out_features, in_features), bias=False
    w0 = jax.random.normal(k0, (layers[0], in_size), dtype=jnp.float32) * 0.1
    w1 = jax.random.normal(k1, (layers[1], layers[0]), dtype=jnp.float32) * 0.1

    # test 1: tiny batch -> single full block
    B = 8
    x = jax.random.uniform(kx, (B, 1, img_size, img_size), dtype=jnp.float32)
    y = jax.block_until_ready(net_forward(x, w0, w1, layers))
    y_ref = net_reference(x, w0, w1, layers)
    assert y.shape == (B, layers[-1]), y.shape
    assert jnp.allclose(y, y_ref, atol=1e-4, rtol=1e-4), "mismatch vs reference (B=8)"

    # test 2: ragged batch with a small tile -> multi-step grid + masked edge block
    B2 = 40
    x2 = jax.random.uniform(kx2, (B2, 1, img_size, img_size), dtype=jnp.float32)
    y2 = jax.block_until_ready(net_forward(x2, w0, w1, layers, tb_max=16))
    y2_ref = net_reference(x2, w0, w1, layers)
    assert y2.shape == (B2, layers[-1]), y2.shape
    assert jnp.allclose(y2, y2_ref, atol=1e-4, rtol=1e-4), "mismatch vs reference (B=40)"

    # test 3: default 512-row tile, multi-step grid with a ragged tail
    B3 = 1040
    x3 = jax.random.uniform(kx3, (B3, 1, img_size, img_size), dtype=jnp.float32)
    y3 = jax.block_until_ready(net_forward(x3, w0, w1, layers))
    y3_ref = net_reference(x3, w0, w1, layers)
    assert y3.shape == (B3, layers[-1]), y3.shape
    assert jnp.allclose(y3, y3_ref, atol=1e-4, rtol=1e-4), "mismatch vs reference (B=1040)"

    print("KERNEL_OK")
</pallas_src>

<mosaic_0001>
module attributes {stable_mosaic.version = 11 : i64} {
  func.func @net_kernel(%arg0: i32, %arg1: memref<8x256xf32, #tpu.memory_space<vmem>>, %arg2: memref<256x32xbf16, #tpu.memory_space<vmem>>, %arg3: memref<32x128xbf16, #tpu.memory_space<vmem>>, %arg4: memref<8x128xi16, #tpu.memory_space<vmem>>) attributes {dimension_semantics = [#tpu.dimension_semantics<parallel>], iteration_bounds = array<i64: 1>, scalar_prefetch = 0 : i64, scratch_operands = 0 : i64, tpu.core_type = #tpu.core_type<tc>, window_params = [{transform_indices = @transform_0, window_bounds = array<i64: 8, 256>}, {pipeline_mode = #tpu.pipeline_mode<synchronous>, transform_indices = @transform_1, window_bounds = array<i64: 256, 32>}, {pipeline_mode = #tpu.pipeline_mode<synchronous>, transform_indices = @transform_2, window_bounds = array<i64: 32, 128>}, {transform_indices = @transform_3, window_bounds = array<i64: 8, 128>}]} {
    %c0 = arith.constant 0 : index
    %c0_0 = arith.constant 0 : index
    %0 = vector.load %arg1[%c0, %c0_0] : memref<8x256xf32, #tpu.memory_space<vmem>>, vector<8x256xf32>
    %cst = arith.constant 5.000000e-01 : f32
    %1 = vector.broadcast %cst : f32 to vector<8x256xf32>
    %2 = arith.cmpf oge, %0, %1 : vector<8x256xf32>
    %cst_1 = arith.constant 1.000000e+00 : f32
    %cst_2 = arith.constant -1.000000e+00 : f32
    %3 = vector.broadcast %cst_1 : f32 to vector<8x256xf32>
    %4 = vector.broadcast %cst_2 : f32 to vector<8x256xf32>
    %5 = arith.select %2, %3, %4 : vector<8x256xi1>, vector<8x256xf32>
    %6 = arith.truncf %5 : vector<8x256xf32> to vector<8x256xbf16>
    %c0_3 = arith.constant 0 : index
    %c0_4 = arith.constant 0 : index
    %7 = vector.load %arg2[%c0_3, %c0_4] : memref<256x32xbf16, #tpu.memory_space<vmem>>, vector<256x32xbf16>
    %cst_5 = arith.constant dense<0.000000e+00> : vector<8x32xf32>
    %8 = tpu.matmul %6, %7, %cst_5 {dimension_numbers = #tpu.dot_dimension_numbers<[1], [0], [0], [1], [0, 0, 1, 1], [], []>} : vector<8x256xbf16>, vector<256x32xbf16>, vector<8x32xf32> -> vector<8x32xf32>
    %cst_6 = arith.constant 0.000000e+00 : f32
    %9 = vector.broadcast %cst_6 : f32 to vector<8x32xf32>
    %10 = arith.maximumf %8, %9 : vector<8x32xf32>
    %11 = arith.truncf %10 : vector<8x32xf32> to vector<8x32xbf16>
    %c0_7 = arith.constant 0 : index
    %c0_8 = arith.constant 0 : index
    %12 = vector.load %arg3[%c0_7, %c0_8] : memref<32x128xbf16, #tpu.memory_space<vmem>>, vector<32x128xbf16>
    %cst_9 = arith.constant dense<0.000000e+00> : vector<8x128xf32>
    %13 = tpu.matmul %11, %12, %cst_9 {dimension_numbers = #tpu.dot_dimension_numbers<[1], [0], [0], [1], [0, 0, 1, 1], [], []>} : vector<8x32xbf16>, vector<32x128xbf16>, vector<8x128xf32> -> vector<8x128xf32>
    %cst_10 = arith.constant 0.000000e+00 : f32
    %14 = vector.broadcast %cst_10 : f32 to vector<8x128xf32>
    %15 = arith.maximumf %13, %14 : vector<8x128xf32>
    %16 = arith.fptosi %15 : vector<8x128xf32> to vector<8x128xi32>
    %17 = arith.trunci %16 : vector<8x128xi32> to vector<8x128xi16>
    %c0_11 = arith.constant 0 : index
    %c0_12 = arith.constant 0 : index
    %18 = vector.load %arg4[%c0_11, %c0_12] : memref<8x128xi16, #tpu.memory_space<vmem>>, vector<8x128xi16>
    tpu.vector_store %arg4[%c0_11, %c0_12], %17 {strides = array<i32>} : memref<8x128xi16, #tpu.memory_space<vmem>>, vector<8x128xi16>,
    return
  }
  func.func @transform_0(%arg0: i32) -> (i32, i32) {
    %c0_i32 = arith.constant 0 : i32
    %c0_i32_0 = arith.constant 0 : i32
    return %arg0, %c0_i32 : i32, i32
  }
  func.func @transform_1(%arg0: i32) -> (i32, i32) {
    %c0_i32 = arith.constant 0 : i32
    %c0_i32_0 = arith.constant 0 : i32
    %c0_i32_1 = arith.constant 0 : i32
    return %c0_i32, %c0_i32_0 : i32, i32
  }
  func.func @transform_2(%arg0: i32) -> (i32, i32) {
    %c0_i32 = arith.constant 0 : i32
    %c0_i32_0 = arith.constant 0 : i32
    %c0_i32_1 = arith.constant 0 : i32
    return %c0_i32, %c0_i32_0 : i32, i32
  }
  func.func @transform_3(%arg0: i32) -> (i32, i32) {
    %c0_i32 = arith.constant 0 : i32
    %c0_i32_0 = arith.constant 0 : i32
    return %arg0, %c0_i32 : i32, i32
  }
}

</mosaic_0001>

<bundles_post_ra>
// kernel: net_forward.1
= control target key start
LH: loop header
LB: loop body
LE: loop exit
PB: predicated region body
PF: predicated region fallthrough
CT: control target
= control target key end

     0   :  { %v336_v12 = vmov -1.0   ;;  %v337_v24 = vmov 0.0   ;;  %vm338_vm2 = vmmov 0   ;;  %vm209_vm3 = vcmask 261120   ;;  %s422_s1 = inlined_call_operand.vmem [shape: bf16[256,32], index: 1, kind: input, shape index: {}]   ;;  %s423_s0 = inlined_call_operand.vmem [shape: f32[8,256], index: 0, kind: input, shape index: {}]   ;;  %s424_s2 = inlined_call_operand.vmem [shape: bf16[32,128], index: 2, kind: input, shape index: {}]   ;;  %s425_s3 = inlined_call_operand.vmem [shape: s16[8,128], index: 3, kind: output, shape index: {}]  }
   0x1   :  { %v318_v0 = vld [vmem:[%s422_s1 + $0x40] sm:$0xff]   ;;  %v320_v2 = vld [vmem:[%s422_s1 + $0x48] sm:$0xff]   ;;  %v322_v4 = vld [vmem:[%s422_s1 + $0x50] sm:$0xff]   ;;  %305 = vmatprep.subr.bf16.mxu1 %v337_v24  ;;  %309 = vmatprep.mubr.msk.bf16.mxu1 %vm338_vm2, %v337_v24 }
   0x2   :  { %v319_v1 = vld [vmem:[%s422_s1] sm:$0xff]   ;;  %280 = vmatprep.subr.bf16.mxu0 %v318_v0  ;;  %v321_v3 = vld [vmem:[%s422_s1 + $0x8] sm:$0xff]   ;;  %v323_v5 = vld [vmem:[%s422_s1 + $0x10] sm:$0xff]  }
   0x3   :  { %281 = vmatpush3.bf16.msra.mxu0 %v319_v1  ;;  %v324_v6 = vld [vmem:[%s422_s1 + $0x58] sm:$0xff]   ;;  %v326_v8 = vld [vmem:[%s422_s1 + $0x60] sm:$0xff]   ;;  %v328_v10 = vld [vmem:[%s422_s1 + $0x68] sm:$0xff]  }
   0x4   :  { %282 = vmatprep.subr.bf16.mxu0 %v320_v2  ;;  %v325_v7 = vld [vmem:[%s422_s1 + $0x18] sm:$0xff]   ;;  %v327_v9 = vld [vmem:[%s422_s1 + $0x20] sm:$0xff]   ;;  %v16_v11 = vld [vmem:[%s423_s0 + $0x8] sm:$0xff] }
   0x5   :  { %vm18_vm0 = vcmp.ge.f32.partialorder %v16_v11, 0.5  ;;  %v329_v14 = vld [vmem:[%s422_s1 + $0x28] sm:$0xff]   ;;  %v330_v16 = vld [vmem:[%s422_s1 + $0x70] sm:$0xff]   ;;  %v15_v17 = vld [vmem:[%s423_s0] sm:$0xff] }
   0x6   :  { %v20_v13 = vsel %vm18_vm0, 1.0, %v336_v12  ;;  %v331_v18 = vld [vmem:[%s422_s1 + $0x30] sm:$0xff]   ;;  %v332_v19 = vld [vmem:[%s422_s1 + $0x78] sm:$0xff]   ;;  %vm17_vm1 = vcmp.ge.f32.partialorder %v15_v17, 0.5  ;;  %v334_v23 = vld [vmem:[%s424_s2] sm:$0xff]  }
   0x7   :  { %283 = vmatpush3.bf16.msra.mxu0 %v321_v3  ;;  %v22_v15 = vpack.c.bf16 %v20_v13, %v20_v13  ;;  %v333_v20 = vld [vmem:[%s422_s1 + $0x38] sm:$0xff]   ;;  %v19_v21 = vsel %vm17_vm1, 1.0, %v336_v12  ;;  %306 = vmatpush3.bf16.msra.mxu1 %v334_v23  ;;  %v335_v25 = vld [vmem:[%s424_s2 + $0x8] sm:$0xff]  }
   0x8   :  { %284 = vmatprep.subr.bf16.mxu0 %v322_v4  ;;  %v21_v22 = vpack.c.bf16 %v19_v21, %v19_v21  ;;  %307 = vmatprep.subr.bf16.mxu1 %v337_v24 }
   0x9   :  { %183 = vmatprep.mubr.bf16.mxu0 %v22_v15 }
   0xb   :  { %285 = vmatpush3.bf16.msra.mxu0 %v323_v5  ;;  %308 = vmatpush3.bf16.msra.mxu1 %v335_v25 }
   0xc   :  { %286 = vmatprep.subr.bf16.mxu0 %v324_v6 }
   0xf   :  { %287 = vmatpush3.bf16.msra.mxu0 %v325_v7 }
  0x10   :  { %288 = vmatprep.subr.bf16.mxu0 %v326_v8 }
  0x13   :  { %289 = vmatpush3.bf16.msra.mxu0 %v327_v9 }
  0x14   :  { %290 = vmatprep.subr.bf16.mxu0 %v328_v10 }
  0x17   :  { %291 = vmatpush3.bf16.msra.mxu0 %v329_v14 }
  0x18   :  { %292 = vmatprep.subr.bf16.mxu0 %v330_v16 }
  0x1b   :  { %293 = vmatpush3.bf16.msra.mxu0 %v331_v18 }
  0x1c   :  { %294 = vmatprep.subr.bf16.mxu0 %v332_v19 }
  0x1f   :  { %295 = vmatpush3.bf16.msra.mxu0 %v333_v20 }
  0x22   :  { %184 = vmatmul.mubr.bf16.vlgmr.msra.gmra.mrb[0].mxu0 %v21_v22 }
  0xf5   :  { %v296_v26 = vpop.f32.mrb[0].mxu0 }
  0xf6   :  { %v297_v27 = vpop.f32.mrb[1].mxu0 }
  0xf7   :  { %v298_v28 = vadd.f32 %v297_v27, %v296_v26  ;;  %v299_v29 = vpop.f32.mrb[2].mxu0 }
  0xf8   :  { %v300_v30 = vpop.f32.mrb[3].mxu0 }
  0xf9   :  { %v191_v31 = vmax.f32 %v298_v28, 0.0 }
  0xfb   :  { %v192_v32 = vpack.c.bf16 %v191_v31, %v191_v31 }
  0xfd   :  { %310 = vmatmul.mubr.msk.bf16.vlgmr.msra.gmra.mrb[0].mxu1 %vm209_vm3, %v192_v32 }
 0x1d0   :  { %v247_v33 = vpop.f32.mrb[0].mxu1 }
 0x1d1   :  { %v253_v34 = vmax.f32 %v247_v33, 0.0  ;;  %v311_v35 = vpop.f32.mrb[1].mxu1 }
 0x1d2   :  { %v250_v36 = vpop.f32.mrb[2].mxu1 }
 0x1d3   :  { %v313_v37 = vtrunc.f32 %v253_v34  ;;  %v312_v38 = vpop.f32.mrb[3].mxu1 }
 0x1d5   :  { %v314_v39 = vcvt.f32.s32 %v313_v37 }
 0x1d7   :  { %v255_v40 = vpack.c.b16 %v314_v39, %v314_v39 }
 0x1d9   :  { %256 = vst [vmem:[%s425_s3] sm:$0xf] %v255_v40 }

</bundles_post_ra>
